<compile_context>
chip_gen: v7x
topology: tpu7x:2x2x1
jax: 0.10.0
libtpu: 0.0.40
codegen_flags: <defaults>
</compile_context>

<pallas_src>
import numpy as np
import jax
import jax.numpy as jnp
from jax.experimental import pallas as pl
from jax.experimental.pallas import tpu as pltpu

NEG_INF = -1e30
BN_EPS = 1e-5
LANE = 128
SUBLANE = 8
MAX_ROW_TILE = 256           # destination-row tile (multiple of 128 once tiling kicks in)


def _rup(x, m):
    return ((x + m - 1) // m) * m


def _node_padding(n):
    """Padded node count and destination-row tile size."""
    np_ = _rup(max(n, SUBLANE), SUBLANE)
    if np_ <= MAX_ROW_TILE:
        return np_, np_
    np_ = _rup(np_, MAX_ROW_TILE)
    return np_, MAX_ROW_TILE


def _whole(shape):
    # whole-array block; index_map ignores grid indices / scalar-prefetch refs
    return pl.BlockSpec(shape, lambda *_: (0,) * len(shape))


def _nbytes(shape, dtype):
    return int(np.prod(shape)) * jnp.dtype(dtype).itemsize


def _cparams(vmem_est, n_parallel=0, n_arbitrary=0):
    sem = ("parallel",) * n_parallel + ("arbitrary",) * n_arbitrary
    vmem = int(min(100 * 2**20, max(16 * 2**20, vmem_est)))
    return pltpu.CompilerParams(dimension_semantics=sem or None,
                                vmem_limit_bytes=vmem)


# ----------------------------------------------------------------------------
# Kernels
# ----------------------------------------------------------------------------
def gat_pre_kernel(h_ref, w_ref, att_ref, hw_ref, sd_ref, ssT_ref):
    """Per row tile: hw = h @ W (bf16 out) and scores s = hw @ [att_dst, att_src].

    Runs once per layer so the (N,Fi)x(Fi,Fo) matmul and the src-score row are
    NOT recomputed per destination tile of the attention kernel."""
    hw = jnp.dot(h_ref[...], w_ref[...], preferred_element_type=jnp.float32)
    hw_bf = hw.astype(jnp.bfloat16)                       # single hoisted cast
    s = jnp.dot(hw_bf, att_ref[...], preferred_element_type=jnp.float32)  # (T, 2)
    hw_ref[...] = hw_bf
    sd_ref[...] = s[:, 0:1]                               # dst-score column
    ssT_ref[...] = s[:, 1:2].T                            # src-score row chunk


def gat_attn_kernel(sd_ref, ssT_ref, adjb_ref, hw_ref, aff_ref, o_ref):
    """Per destination-row tile: masked softmax attention, aggregation,
    fused (folded) BatchNorm + bias + ReLU epilogue."""
    e = sd_ref[...] + ssT_ref[...]                        # (T, Np) f32
    e = jnp.maximum(e, 0.2 * e)                           # LeakyReLU(0.2), 2 VALU ops
    e = e + adjb_ref[...]                                 # bf16 additive mask -> f32
    e = e - jnp.max(e, axis=-1, keepdims=True)            # stable softmax
    p = jnp.exp(e)                                        # non-edges underflow to 0
    inv = pl.reciprocal(jnp.sum(p, axis=-1, keepdims=True), approx=True)   # (T, 1)
    out = jnp.dot(p.astype(jnp.bfloat16), hw_ref[...],
                  preferred_element_type=jnp.float32)     # unnormalized aggregate
    out = out * inv                                       # deferred softmax normalization
    scale = aff_ref[0:1, :]
    shift = aff_ref[1:2, :]
    o_ref[...] = jnp.maximum(out * scale + shift, 0.0).astype(jnp.bfloat16)


def make_tail_kernel(n_fc, m_pad):
    """Gather x[mask] rows by index (scalar prefetch) -> FC stack -> final linear."""
    def kernel(idx_ref, h_ref, *rest):
        fc_refs = [rest[2 * i: 2 * i + 2] for i in range(n_fc)]
        ow_ref, ob_ref = rest[2 * n_fc], rest[2 * n_fc + 1]
        o_ref = rest[2 * n_fc + 2]
        zbuf = rest[2 * n_fc + 3]
        # Row gather replaces the dense one-hot selection matmul.
        # TODO(synk): for large M, grid this gather (pl.Element index_map) instead
        #             of the static unrolled row-copy loop.
        for i in range(m_pad):
            zbuf[pl.ds(i, 1), :] = h_ref[pl.ds(idx_ref[i], 1), :]
        z = zbuf[...]
        for (w_ref, b_ref) in fc_refs:                    # BN pre-folded into W', b'
            z = jnp.maximum(
                jnp.dot(z, w_ref[...], preferred_element_type=jnp.float32)
                + b_ref[...], 0.0).astype(jnp.bfloat16)
        o_ref[...] = jnp.dot(z, ow_ref[...],
                             preferred_element_type=jnp.float32) + ob_ref[...]
    return kernel


# ----------------------------------------------------------------------------
# Parameter init (torch-like shapes, eval-mode BN stats)
# ----------------------------------------------------------------------------
def init_params(key, n_features, gnn_hidden, lin_hidden, n_classes):
    params = {"gat": [], "fc": [], "out": None}
    dims_g = [n_features] + list(gnn_hidden)
    for i in range(len(gnn_hidden)):
        key, k1, k2, k3 = jax.random.split(key, 4)
        Fi, Fo = dims_g[i], dims_g[i + 1]
        lim_w = float(np.sqrt(6.0 / (Fi + Fo)))
        lim_a = float(np.sqrt(6.0 / (Fo + 1)))
        params["gat"].append(dict(
            W=jax.random.uniform(k1, (Fi, Fo), jnp.float32, -lim_w, lim_w),
            att_src=jax.random.uniform(k2, (Fo,), jnp.float32, -lim_a, lim_a),
            att_dst=jax.random.uniform(k3, (Fo,), jnp.float32, -lim_a, lim_a),
            bias=jnp.zeros((Fo,), jnp.float32),
            bn_gamma=jnp.ones((Fo,), jnp.float32),
            bn_beta=jnp.zeros((Fo,), jnp.float32),
            bn_mean=jnp.zeros((Fo,), jnp.float32),
            bn_var=jnp.ones((Fo,), jnp.float32),
        ))
    dims_l = [gnn_hidden[-1]] + list(lin_hidden)
    for i in range(len(lin_hidden)):
        key, k1, k2 = jax.random.split(key, 3)
        Fi, Fo = dims_l[i], dims_l[i + 1]
        lim = 1.0 / float(np.sqrt(Fi))
        params["fc"].append(dict(
            W=jax.random.uniform(k1, (Fi, Fo), jnp.float32, -lim, lim),
            b=jax.random.uniform(k2, (Fo,), jnp.float32, -lim, lim),
            bn_gamma=jnp.ones((Fo,), jnp.float32),
            bn_beta=jnp.zeros((Fo,), jnp.float32),
            bn_mean=jnp.zeros((Fo,), jnp.float32),
            bn_var=jnp.ones((Fo,), jnp.float32),
        ))
    key, k1, k2 = jax.random.split(key, 3)
    Fi = dims_l[-1]
    lim = 1.0 / float(np.sqrt(Fi))
    params["out"] = dict(
        W=jax.random.uniform(k1, (Fi, n_classes), jnp.float32, -lim, lim),
        b=jax.random.uniform(k2, (n_classes,), jnp.float32, -lim, lim),
    )
    return params


# ----------------------------------------------------------------------------
# One-time preparation: fold BN, pad to lane-dense shapes, bf16 adjacency bias
# ----------------------------------------------------------------------------
def prepare_model(params, adj, mask_idx):
    adj = np.asarray(adj, np.float32)
    mask_idx = np.asarray(mask_idx, np.int64)
    N = adj.shape[0]
    M = int(mask_idx.shape[0])
    Np, TILE = _node_padding(N)
    Mp = _rup(max(M, SUBLANE), SUBLANE)

    # additive mask, bf16: 0 on edges (incl. self loops), -1e30 otherwise;
    # padded destination rows get a self loop so their softmax rows stay finite.
    adjb = np.full((Np, Np), NEG_INF, np.float32)
    adjb[:N, :N] = np.where(adj > 0.0, 0.0, NEG_INF)
    for i in range(N, Np):
        adjb[i, i] = 0.0

    idx = np.zeros((Mp,), np.int32)
    idx[:M] = mask_idx.astype(np.int32)

    gat = []
    Fi_p = _rup(params["gat"][0]["W"].shape[0], LANE)
    F0p = Fi_p
    for p in params["gat"]:
        Fi, Fo = p["W"].shape
        Fo_p = _rup(Fo, LANE)
        scale = np.asarray(p["bn_gamma"]) / np.sqrt(np.asarray(p["bn_var"]) + BN_EPS)
        shift = np.asarray(p["bn_beta"]) - np.asarray(p["bn_mean"]) * scale
        cshift = np.asarray(p["bias"]) * scale + shift      # GAT bias folded in
        Wp = np.zeros((Fi_p, Fo_p), np.float32); Wp[:Fi, :Fo] = np.asarray(p["W"])
        att = np.zeros((Fo_p, 2), np.float32)
        att[:Fo, 0] = np.asarray(p["att_dst"])
        att[:Fo, 1] = np.asarray(p["att_src"])
        aff = np.zeros((2, Fo_p), np.float32)               # packed scale/shift
        aff[0, :Fo] = scale
        aff[1, :Fo] = cshift
        gat.append(dict(W=jnp.asarray(Wp, jnp.bfloat16),
                        att=jnp.asarray(att, jnp.bfloat16),
                        aff=jnp.asarray(aff),
                        Fi_p=Fi_p, Fo_p=Fo_p))
        Fi_p = Fo_p

    fc = []
    for p in params["fc"]:
        Fi, Fo = p["W"].shape
        Fo_p = _rup(Fo, LANE)
        scale = np.asarray(p["bn_gamma"]) / np.sqrt(np.asarray(p["bn_var"]) + BN_EPS)
        shift = np.asarray(p["bn_beta"]) - np.asarray(p["bn_mean"]) * scale
        Wf = np.asarray(p["W"]) * scale[None, :]            # BN folded into W
        bf = np.asarray(p["b"]) * scale + shift
        Wp = np.zeros((Fi_p, Fo_p), np.float32); Wp[:Fi, :Fo] = Wf
        bp = np.zeros((1, Fo_p), np.float32); bp[0, :Fo] = bf
        fc.append(dict(W=jnp.asarray(Wp, jnp.bfloat16), b=jnp.asarray(bp),
                       Fi_p=Fi_p, Fo_p=Fo_p))
        Fi_p = Fo_p

    Fi, C = params["out"]["W"].shape
    Cp = _rup(C, LANE)
    Wp = np.zeros((Fi_p, Cp), np.float32); Wp[:Fi, :C] = np.asarray(params["out"]["W"])
    bp = np.zeros((1, Cp), np.float32); bp[0, :C] = np.asarray(params["out"]["b"])

    return dict(Np=Np, tile=TILE, Mp=Mp, M=M, F0p=F0p, Cp=Cp, n_classes=C,
                adjb=jnp.asarray(adjb, jnp.bfloat16),
                idx=jnp.asarray(idx),
                gat=gat, fc=fc,
                out_W=jnp.asarray(Wp, jnp.bfloat16), out_b=jnp.asarray(bp))


def pad_input(prep, x):
    """Pad / cast node features once, outside the per-call hot path."""
    N, F = x.shape
    xp = jnp.zeros((prep["Np"], prep["F0p"]), jnp.bfloat16)
    return xp.at[:N, :F].set(x.astype(jnp.bfloat16))


# ----------------------------------------------------------------------------
# Forward
# ----------------------------------------------------------------------------
def gatfc_forward(prep, xp):
    Np, TILE, Mp, Cp = prep["Np"], prep["tile"], prep["Mp"], prep["Cp"]
    grid = (Np // TILE,)
    adjb = prep["adjb"]

    h = xp
    for lyr in prep["gat"]:
        Fi_p, Fo_p = lyr["Fi_p"], lyr["Fo_p"]

        pre_bytes = 2 * (_nbytes((TILE, Fi_p), jnp.bfloat16)
                         + _nbytes((Fi_p, Fo_p), jnp.bfloat16)
                         + _nbytes((Fo_p, 2), jnp.bfloat16)
                         + _nbytes((TILE, Fo_p), jnp.bfloat16)
                         + _nbytes((TILE, 1), jnp.float32)
                         + _nbytes((1, TILE), jnp.float32)) \
            + 2 * TILE * Fo_p * 4 + (4 << 20)
        hw, sd, ssT = pl.pallas_call(
            gat_pre_kernel,
            out_shape=(jax.ShapeDtypeStruct((Np, Fo_p), jnp.bfloat16),
                       jax.ShapeDtypeStruct((Np, 1), jnp.float32),
                       jax.ShapeDtypeStruct((1, Np), jnp.float32)),
            grid=grid,
            in_specs=[pl.BlockSpec((TILE, Fi_p), lambda i: (i, 0)),
                      _whole((Fi_p, Fo_p)),
                      _whole((Fo_p, 2))],
            out_specs=(pl.BlockSpec((TILE, Fo_p), lambda i: (i, 0)),
                       pl.BlockSpec((TILE, 1), lambda i: (i, 0)),
                       pl.BlockSpec((1, TILE), lambda i: (0, i))),
            compiler_params=_cparams(pre_bytes, n_parallel=1),
        )(h, lyr["W"], lyr["att"])

        attn_bytes = 2 * (_nbytes((TILE, 1), jnp.float32)
                          + _nbytes((1, Np), jnp.float32)
                          + _nbytes((TILE, Np), jnp.bfloat16)
                          + _nbytes((Np, Fo_p), jnp.bfloat16)
                          + _nbytes((2, Fo_p), jnp.float32)
                          + _nbytes((TILE, Fo_p), jnp.bfloat16)) \
            + 4 * TILE * Np * 4 + (4 << 20)
        h = pl.pallas_call(
            gat_attn_kernel,
            out_shape=jax.ShapeDtypeStruct((Np, Fo_p), jnp.bfloat16),
            grid=grid,
            in_specs=[pl.BlockSpec((TILE, 1), lambda i: (i, 0)),
                      _whole((1, Np)),
                      pl.BlockSpec((TILE, Np), lambda i: (i, 0)),   # pipelined row tiles
                      _whole((Np, Fo_p)),
                      _whole((2, Fo_p))],
            out_specs=pl.BlockSpec((TILE, Fo_p), lambda i: (i, 0)),
            compiler_params=_cparams(attn_bytes, n_parallel=1),
        )(sd, ssT, adjb, hw, lyr["aff"])

    # ---- tail: index gather of x[mask] + FC stack + final linear (one call) ----
    F_last_p = prep["gat"][-1]["Fo_p"]
    n_fc = len(prep["fc"])
    tail_ops = [h]
    tail_specs = [_whole((Np, F_last_p))]
    for f in prep["fc"]:
        tail_ops += [f["W"], f["b"]]
        tail_specs += [_whole(f["W"].shape), _whole(f["b"].shape)]
    tail_ops += [prep["out_W"], prep["out_b"]]
    tail_specs += [_whole(prep["out_W"].shape), _whole(prep["out_b"].shape)]

    tail_bytes = 2 * sum(_nbytes(o.shape, o.dtype) for o in tail_ops) \
        + 2 * _nbytes((Mp, Cp), jnp.float32) \
        + _nbytes((Mp, F_last_p), jnp.bfloat16) + (4 << 20)
    out_p = pl.pallas_call(
        make_tail_kernel(n_fc, Mp),
        out_shape=jax.ShapeDtypeStruct((Mp, Cp), jnp.float32),
        grid_spec=pltpu.PrefetchScalarGridSpec(
            num_scalar_prefetch=1,
            grid=(1,),
            in_specs=tail_specs,
            out_specs=_whole((Mp, Cp)),
            scratch_shapes=[pltpu.VMEM((Mp, F_last_p), jnp.bfloat16)]),
        compiler_params=_cparams(tail_bytes, n_arbitrary=1),
    )(prep["idx"], *tail_ops)

    return out_p[:prep["M"], :prep["n_classes"]]


# ----------------------------------------------------------------------------
# Pure-JAX f32 reference (exact eval-mode semantics) for validation
# ----------------------------------------------------------------------------
def reference_forward(params, x, adj, mask_idx):
    h = x.astype(jnp.float32)
    for p in params["gat"]:
        hw = h @ p["W"]
        d = hw @ p["att_dst"]
        s = hw @ p["att_src"]
        e = d[:, None] + s[None, :]
        e = jnp.where(e > 0, e, 0.2 * e)
        mask = adj > 0
        e = jnp.where(mask, e, -jnp.inf)
        e = e - jnp.max(e, axis=-1, keepdims=True)
        pe = jnp.where(mask, jnp.exp(e), 0.0)
        alpha = pe / jnp.sum(pe, axis=-1, keepdims=True)
        out = alpha @ hw + p["bias"][None, :]
        scale = p["bn_gamma"] / jnp.sqrt(p["bn_var"] + BN_EPS)
        out = (out - p["bn_mean"][None, :]) * scale[None, :] + p["bn_beta"][None, :]
        h = jnp.maximum(out, 0.0)
    z = h[mask_idx]
    for p in params["fc"]:
        zz = z @ p["W"] + p["b"][None, :]
        scale = p["bn_gamma"] / jnp.sqrt(p["bn_var"] + BN_EPS)
        zz = (zz - p["bn_mean"][None, :]) * scale[None, :] + p["bn_beta"][None, :]
        z = jnp.maximum(zz, 0.0)
    return z @ params["out"]["W"] + params["out"]["b"][None, :]


# TODO(synk): Dropout and training-mode BatchNorm (batch statistics) are not
#             implemented; forward reproduces inference/eval-mode semantics.

if __name__ == "__main__":
    # Small config consistent with GATFCModel.__init__
    N = 16                   # number of graph nodes
    n_features = 8
    gnn_hidden = [32, 32]    # gnns_forward_hidden, gnn_forward_layer_num=2
    lin_hidden = [32, 16]    # linears_hidden,      linear_layer_num=2
    n_classes = 2

    key = jax.random.PRNGKey(0)
    key, kx = jax.random.split(key)
    x = jax.random.normal(kx, (N, n_features), jnp.float32)

    # edge_index: directed ring both ways; dense adjacency + self loops
    src = np.concatenate([np.arange(N), (np.arange(N) + 1) % N])
    dst = np.concatenate([(np.arange(N) + 1) % N, np.arange(N)])
    adj_np = np.zeros((N, N), np.float32)
    adj_np[dst, src] = 1.0                   # adj[i, j] = 1  <=>  edge j -> i
    np.fill_diagonal(adj_np, 1.0)            # self loops (GATConv default)
    adj = jnp.asarray(adj_np)

    # mask: select first 8 nodes (like x[mask] in torch)
    mask_np = np.array([True] * 8 + [False] * 8)
    mask_idx_np = np.nonzero(mask_np)[0]
    mask_idx = jnp.asarray(mask_idx_np.astype(np.int32))

    params = init_params(key, n_features, gnn_hidden, lin_hidden, n_classes)
    prep = prepare_model(params, adj_np, mask_idx_np)

    xp = pad_input(prep, x)                  # pad/cast once, outside the hot path
    out = gatfc_forward(prep, xp)
    out = jax.block_until_ready(out)

    assert out.shape == (int(mask_np.sum()), n_classes)
    assert bool(jnp.all(jnp.isfinite(out)))

    ref = reference_forward(params, x, adj, mask_idx)
    err = float(jnp.max(jnp.abs(out - ref)))
    assert err < 0.15, f"max abs error vs f32 reference: {err}"

    print("KERNEL_OK")
</pallas_src>

<mosaic_0001>
module attributes {stable_mosaic.version = 11 : i64} {
  func.func @gat_pre_kernel(%arg0: i32, %arg1: memref<16x128xbf16, #tpu.memory_space<vmem>>, %arg2: memref<128x128xbf16, #tpu.memory_space<vmem>>, %arg3: memref<128x2xbf16, #tpu.memory_space<vmem>>, %arg4: memref<16x128xbf16, #tpu.memory_space<vmem>>, %arg5: memref<16x1xf32, #tpu.memory_space<vmem>>, %arg6: memref<1x16xf32, #tpu.memory_space<vmem>>) attributes {dimension_semantics = [#tpu.dimension_semantics<parallel>], iteration_bounds = array<i64: 1>, scalar_prefetch = 0 : i64, scratch_operands = 0 : i64, tpu.core_type = #tpu.core_type<tc>, window_params = [{transform_indices = @transform_0, window_bounds = array<i64: 16, 128>}, {pipeline_mode = #tpu.pipeline_mode<synchronous>, transform_indices = @transform_1, window_bounds = array<i64: 128, 128>}, {pipeline_mode = #tpu.pipeline_mode<synchronous>, transform_indices = @transform_2, window_bounds = array<i64: 128, 2>}, {transform_indices = @transform_3, window_bounds = array<i64: 16, 128>}, {transform_indices = @transform_4, window_bounds = array<i64: 16, 1>}, {transform_indices = @transform_5, window_bounds = array<i64: 1, 16>}]} {
    %c0 = arith.constant 0 : index
    %c0_0 = arith.constant 0 : index
    %0 = vector.load %arg1[%c0, %c0_0] : memref<16x128xbf16, #tpu.memory_space<vmem>>, vector<16x128xbf16>
    %c0_1 = arith.constant 0 : index
    %c0_2 = arith.constant 0 : index
    %1 = vector.load %arg2[%c0_1, %c0_2] : memref<128x128xbf16, #tpu.memory_space<vmem>>, vector<128x128xbf16>
    %cst = arith.constant dense<0.000000e+00> : vector<16x128xf32>
    %2 = tpu.matmul %0, %1, %cst {dimension_numbers = #tpu.dot_dimension_numbers<[1], [0], [0], [1], [0, 0, 1, 1], [], []>} : vector<16x128xbf16>, vector<128x128xbf16>, vector<16x128xf32> -> vector<16x128xf32>
    %3 = arith.truncf %2 : vector<16x128xf32> to vector<16x128xbf16>
    %c0_3 = arith.constant 0 : index
    %c0_4 = arith.constant 0 : index
    %4 = vector.load %arg3[%c0_3, %c0_4] : memref<128x2xbf16, #tpu.memory_space<vmem>>, vector<128x2xbf16>
    %cst_5 = arith.constant dense<0.000000e+00> : vector<16x2xf32>
    %5 = tpu.matmul %3, %4, %cst_5 {dimension_numbers = #tpu.dot_dimension_numbers<[1], [0], [0], [1], [0, 0, 1, 1], [], []>} : vector<16x128xbf16>, vector<128x2xbf16>, vector<16x2xf32> -> vector<16x2xf32>
    %c0_6 = arith.constant 0 : index
    %c0_7 = arith.constant 0 : index
    %6 = vector.load %arg4[%c0_6, %c0_7] : memref<16x128xbf16, #tpu.memory_space<vmem>>, vector<16x128xbf16>
    tpu.vector_store %arg4[%c0_6, %c0_7], %3 {strides = array<i32>} : memref<16x128xbf16, #tpu.memory_space<vmem>>, vector<16x128xbf16>,
    %7 = vector.extract_strided_slice %5 {offsets = [0, 0], sizes = [16, 1], strides = [1, 1]} : vector<16x2xf32> to vector<16x1xf32>
    %c0_8 = arith.constant 0 : index
    %c0_9 = arith.constant 0 : index
    %8 = vector.load %arg5[%c0_8, %c0_9] : memref<16x1xf32, #tpu.memory_space<vmem>>, vector<16x1xf32>
    tpu.vector_store %arg5[%c0_8, %c0_9], %7 {strides = array<i32>} : memref<16x1xf32, #tpu.memory_space<vmem>>, vector<16x1xf32>,
    %9 = vector.extract_strided_slice %5 {offsets = [0, 1], sizes = [16, 1], strides = [1, 1]} : vector<16x2xf32> to vector<16x1xf32>
    %10 = tpu.transpose %9, [1, 0] : vector<16x1xf32> -> vector<1x16xf32>
    %c0_10 = arith.constant 0 : index
    %c0_11 = arith.constant 0 : index
    %11 = vector.load %arg6[%c0_10, %c0_11] : memref<1x16xf32, #tpu.memory_space<vmem>>, vector<1x16xf32>
    tpu.vector_store %arg6[%c0_10, %c0_11], %10 {strides = array<i32>} : memref<1x16xf32, #tpu.memory_space<vmem>>, vector<1x16xf32>,
    return
  }
  func.func @transform_0(%arg0: i32) -> (i32, i32) {
    %c0_i32 = arith.constant 0 : i32
    %c0_i32_0 = arith.constant 0 : i32
    return %arg0, %c0_i32 : i32, i32
  }
  func.func @transform_1(%arg0: i32) -> (i32, i32) {
    %c0_i32 = arith.constant 0 : i32
    %c0_i32_0 = arith.constant 0 : i32
    %c0_i32_1 = arith.constant 0 : i32
    return %c0_i32, %c0_i32_0 : i32, i32
  }
  func.func @transform_2(%arg0: i32) -> (i32, i32) {
    %c0_i32 = arith.constant 0 : i32
    %c0_i32_0 = arith.constant 0 : i32
    %c0_i32_1 = arith.constant 0 : i32
    return %c0_i32, %c0_i32_0 : i32, i32
  }
  func.func @transform_3(%arg0: i32) -> (i32, i32) {
    %c0_i32 = arith.constant 0 : i32
    %c0_i32_0 = arith.constant 0 : i32
    return %arg0, %c0_i32 : i32, i32
  }
  func.func @transform_4(%arg0: i32) -> (i32, i32) {
    %c0_i32 = arith.constant 0 : i32
    %c0_i32_0 = arith.constant 0 : i32
    return %arg0, %c0_i32 : i32, i32
  }
  func.func @transform_5(%arg0: i32) -> (i32, i32) {
    %c0_i32 = arith.constant 0 : i32
    %c0_i32_0 = arith.constant 0 : i32
    return %c0_i32, %arg0 : i32, i32
  }
}

</mosaic_0001>

<bundles_post_ra>
// kernel: tpu_custom_call.1
= control target key start
LH: loop header
LB: loop body
LE: loop exit
PB: predicated region body
PF: predicated region fallthrough
CT: control target
= control target key end

     0   :  { %11 = vsyncpa [#allocation3], 0  ;;  %s657_s0 = inlined_call_operand.hbm [shape: bf16[16,128], index: 0, kind: input, shape index: {}]   ;;  %s658_s1 = inlined_call_operand.vmem [shape: bf16[128,128], index: 1, kind: input, shape index: {}]   ;;  %s659_s2 = inlined_call_operand.vmem [shape: bf16[128,2], index: 2, kind: input, shape index: {}]   ;;  %s660_s3 = inlined_call_operand.hbm [shape: bf16[16,128], index: 3, kind: output, shape index: {0}]   ;;  %s661_s4 = inlined_call_operand.vmem [shape: f32[16,1], index: 4, kind: output, shape index: {1}]   ;;  %s662_s5 = inlined_call_operand.hbm [shape: f32[1,16], index: 5, kind: output, shape index: {2}]  }
   0x1   :  { %12 = vsyncpa [#allocation4], 0 }
   0x2   :  { %13 = vsyncpa [#allocation7], 0  ;;  %s523_s18 = smov [#allocation2]   ;;  %s451_s22 = scalar_lea.hbm %s657_s0, 128 }
   0x3   :  { %s19_s19 = sshll.u32 %s523_s18, 4  ;;  %p452_p0 = scmp.ne.s32.totalorder %s657_s0, %s451_s22  ;;  %s20_s19 = int_to_ptr.vmem [resolvable:$true] %s19_s19 }
   0x4   :  { %p455_p1 = scmp.lt.u32.totalorder %s451_s22, %s657_s0 }
   0x6   :  { %p457_p2 = pnand %p455_p1, %p452_p0 }
   0x8   :  { %460 = shalt.err (!%p457_p2)
}
   0x9   :  { %s461_s27 = scalar_lea.vmem %s20_s19, 128  ;;  %p466_p4 = scmp.lt.s32.totalorder %s20_s19, %s20_s19 }
   0xa   :  { %p462_p3 = scmp.ne.s32.totalorder %s20_s19, %s461_s27  ;;  %p467_p5 = scmp.lt.s32.totalorder %s461_s27, %s461_s27 }
   0xc   :  { %p468_p6 = por %p467_p5, %p466_p4 }
   0xe   :  { %p469_p7 = pnand %p468_p6, %p462_p3 }
  0x10   :  { %472 = shalt.err (!%p469_p7)
}
  0x11   :  { %s524_s28 = smov 64   ;;  %s525_s29 = smov 4  }
  0x12   :  { %25 = dma.hbm_to_vmem [thread:$0]  %s657_s0, 128, %s20_s19, [#allocation3], %s524_s28, %s524_s28, %s525_s29  }
  0x13   :  { %517 = dma.done.wait [#allocation3], 128  }
  0x14   :  { %518 = vsyncadd [#allocation3], 4294967168  ;;  %v526_v0 = vmov 0.0   ;;  %vm527_vm0 = vmmov 0   ;;  %v434_v1 = vld [vmem:[%s658_s1] sm:$0xff]   ;;  %v435_v2 = vld [vmem:[%s658_s1 + $0x8] sm:$0xff]  }
  0x15   :  { %386 = vmatprep.subr.bf16.mxu0 %v526_v0  ;;  %402 = vmatprep.mubr.msk.bf16.mxu0 %vm527_vm0, %v526_v0  ;;  %v436_v3 = vld [vmem:[%s658_s1 + $0x10] sm:$0xff]   ;;  %v443_v4 = vld [vmem:[%s659_s2] sm:$0xff]   ;;  %v437_v5 = vld [vmem:[%s658_s1 + $0x18] sm:$0xff]   ;;  %vm262_vm1 = vcmask 7168   ;;  %s528_s15 = smov 127   ;;  %s529_s17 = smov [#allocation5]  }
  0x16   :  { %406 = vmatprep.subr.bf16.mxu1 %v526_v0  ;;  %422 = vmatprep.mubr.msk.bf16.mxu1 %vm527_vm0, %v526_v0  ;;  %v444_v6 = vld [vmem:[%s659_s2 + $0x8] sm:$0xff]   ;;  %v438_v7 = vld [vmem:[%s658_s1 + $0x20] sm:$0xff]   ;;  %v445_v8 = vld [vmem:[%s659_s2 + $0x10] sm:$0xff]   ;;  %s312_s18 = sshll.u32 %s529_s17, 4  ;;  %s313_s18 = int_to_ptr.vmem [resolvable:$true] %s312_s18 }
  0x17   :  { %387 = vmatpush3.bf16.msra.mxu0 %v434_v1  ;;  %407 = vmatpush3.bf16.msra.mxu1 %v443_v4  ;;  %v439_v9 = vld [vmem:[%s658_s1 + $0x28] sm:$0xff]   ;;  %v446_v10 = vld [vmem:[%s659_s2 + $0x18] sm:$0xff]   ;;  %v440_v11 = vld [vmem:[%s658_s1 + $0x30] sm:$0xff]   ;;  %s473_s19 = scalar_lea.vmem %s313_s18, 128  ;;  %p478_p9 = scmp.lt.s32.totalorder %s313_s18, %s313_s18 }
  0x18   :  { %388 = vmatprep.subr.bf16.mxu0 %v526_v0  ;;  %408 = vmatprep.subr.bf16.mxu1 %v526_v0  ;;  %v447_v12 = vld [vmem:[%s659_s2 + $0x20] sm:$0xff]   ;;  %v441_v13 = vld [vmem:[%s658_s1 + $0x38] sm:$0xff]   ;;  %v448_v14 = vld [vmem:[%s659_s2 + $0x28] sm:$0xff]   ;;  %p474_p8 = scmp.ne.s32.totalorder %s313_s18, %s473_s19  ;;  %p479_p10 = scmp.lt.s32.totalorder %s473_s19, %s473_s19 }
  0x19   :  { %v442_v15 = vld [vmem:[#allocation2] sm:$0xff]   ;;  %v449_v16 = vld [vmem:[%s659_s2 + $0x30] sm:$0xff]   ;;  %v450_v17 = vld [vmem:[%s659_s2 + $0x38] sm:$0xff]  }
  0x1a   :  { %p480_p11 = por %p479_p10, %p478_p9 }
  0x1b   :  { %389 = vmatpush3.bf16.msra.mxu0 %v435_v2  ;;  %409 = vmatpush3.bf16.msra.mxu1 %v444_v6 }
  0x1c   :  { %390 = vmatprep.subr.bf16.mxu0 %v526_v0  ;;  %410 = vmatprep.subr.bf16.mxu1 %v526_v0  ;;  %p481_p12 = pnand %p480_p11, %p474_p8 }
  0x1f   :  { %391 = vmatpush3.bf16.msra.mxu0 %v436_v3  ;;  %411 = vmatpush3.bf16.msra.mxu1 %v445_v8 }
  0x20   :  { %392 = vmatprep.subr.bf16.mxu0 %v526_v0  ;;  %412 = vmatprep.subr.bf16.mxu1 %v526_v0 }
  0x23   :  { %393 = vmatpush3.bf16.msra.mxu0 %v437_v5  ;;  %413 = vmatpush3.bf16.msra.mxu1 %v446_v10 }
  0x24   :  { %394 = vmatprep.subr.bf16.mxu0 %v526_v0  ;;  %414 = vmatprep.subr.bf16.mxu1 %v526_v0 }
  0x27   :  { %395 = vmatpush3.bf16.msra.mxu0 %v438_v7  ;;  %415 = vmatpush3.bf16.msra.mxu1 %v447_v12 }
  0x28   :  { %396 = vmatprep.subr.bf16.mxu0 %v526_v0  ;;  %416 = vmatprep.subr.bf16.mxu1 %v526_v0 }
  0x2b   :  { %397 = vmatpush3.bf16.msra.mxu0 %v439_v9  ;;  %417 = vmatpush3.bf16.msra.mxu1 %v448_v14 }
  0x2c   :  { %398 = vmatprep.subr.bf16.mxu0 %v526_v0  ;;  %418 = vmatprep.subr.bf16.mxu1 %v526_v0 }
  0x2f   :  { %399 = vmatpush3.bf16.msra.mxu0 %v440_v11  ;;  %419 = vmatpush3.bf16.msra.mxu1 %v449_v16 }
  0x30   :  { %400 = vmatprep.subr.bf16.mxu0 %v526_v0  ;;  %420 = vmatprep.subr.bf16.mxu1 %v526_v0 }
  0x33   :  { %401 = vmatpush3.bf16.msra.mxu0 %v441_v13  ;;  %421 = vmatpush3.bf16.msra.mxu1 %v450_v17 }
  0x36   :  { %403 = vmatmul.mubr.bf16.vlgmr.msra.gmra.mrb[0].mxu0 %v442_v15 }
 0x109   :  { %v140_v18 = vpop.f32.mrb[0].mxu0 }
 0x10a   :  { %v404_v19 = vpop.f32.mrb[1].mxu0 }
 0x10b   :  { %v143_v20 = vpop.f32.mrb[2].mxu0 }
 0x10c   :  { %v147_v21 = vpack.c.bf16 %v143_v20, %v140_v18  ;;  %v405_v22 = vpop.f32.mrb[3].mxu0 }
 0x10e   :  { %367 = vst [vmem:[#allocation5] sm:$0xff] %v147_v21   ;;  %423 = vmatmul.mubr.bf16.vlgmr.msra.gmra.mrb[0].mxu1 %v147_v21 }
 0x1e1   :  { %v246_v23 = vpop.f32.mrb[0].mxu1 }
 0x1e2   :  { %263 = vst.msk [vmem:[%s661_s4] sm:$0xff] %vm262_vm1, %v246_v23  ;;  %267 = vrot.lane.b32.xlu0 %v246_v23, %s528_s15  ;;  %v424_v24 = vpop.f32.mrb[1].mxu1 }
 0x1e3   :  { %v249_v25 = vpop.f32.mrb[2].mxu1 }
 0x1e4   :  { %264 = vst.msk [vmem:[%s661_s4 + $0x8] sm:$0xff] %vm262_vm1, %v249_v25  ;;  %v425_v26 = vpop.f32.mrb[3].mxu1 }
 0x1e6   :  { %269 = vrot.lane.b32.xlu0 %v249_v25, %s528_s15 }
 0x254   :  { %v268_v27 = vpop.permute.xlu0 %267 }
 0x255   :  { %273 = vxpose.xlu1.b32.start [1/2] (short) (narrow) %v268_v27, 8 }
 0x256   :  { %484 = shalt.err (!%p481_p12)
}
 0x257   :  { %s485_s22 = scalar_lea.hbm %s660_s3, 128 }
 0x258   :  { %p486_p13 = scmp.ne.s32.totalorder %s660_s3, %s485_s22  ;;  %p489_p0 = scmp.lt.u32.totalorder %s485_s22, %s660_s3 }
 0x25a   :  { %p491_p1 = pnand %p489_p0, %p486_p13 }
 0x25c   :  { %494 = shalt.err (!%p491_p1)
}
 0x25d   :  { %318 = dma.vmem_to_hbm [thread:$0]  %s313_s18, 128, %s660_s3, [#allocation4], %s524_s28, %s524_s28, %s525_s29   ;;  %v270_v28 = vpop.permute.xlu0 %269  ;;  %vm305_vm2 = vcmask 122880  }
 0x25e   :  { %274 = vxpose.xlu1.b32.end [2/2] (short) (narrow) %v270_v28, 8  ;;  %s530_s30 = smov [#allocation6]  }
 0x25f   :  { %s327_s6 = sshll.u32 %s530_s30, 4  ;;  %s328_s6 = int_to_ptr.vmem [resolvable:$true] %s327_s6 }
 0x260   :  { %s495_s7 = scalar_lea.vmem %s328_s6, 16  ;;  %s499_s8 = scalar_lea.vmem %s328_s6, 32 }
 0x261   :  { %p496_p2 = scmp.ne.s32.totalorder %s328_s6, %s495_s7  ;;  %p500_p3 = scmp.lt.s32.totalorder %s328_s6, %s328_s6 }
 0x262   :  { %p501_p4 = scmp.lt.s32.totalorder %s499_s8, %s495_s7 }
 0x264   :  { %p502_p5 = por %p501_p4, %p500_p3 }
 0x266   :  { %p503_p6 = pnand %p502_p5, %p496_p2 }
 0x2da   :  { %v289_v29 = vpop.trf.xlu1 }
 0x2db   :  { %306 = vst.msk [vmem:[#allocation6] sm:$0x1] %vm305_vm2, %v289_v29 }
 0x2dc   :  { %506 = shalt.err (!%p503_p6)
}
 0x2dd   :  { %s507_s3 = scalar_lea.hbm %s662_s5, 16 }
 0x2de   :  { %p508_p7 = scmp.ne.s32.totalorder %s662_s5, %s507_s3  ;;  %p511_p8 = scmp.lt.u32.totalorder %s507_s3, %s662_s5 }
 0x2e0   :  { %p513_p9 = pnand %p511_p8, %p508_p7 }
 0x2e2   :  { %516 = shalt.err (!%p513_p9)
}
 0x2e3   :  { %330 = dma.vmem_to_hbm [thread:$0]  %s328_s6, 16, %s662_s5, [#allocation7]  }
 0x2e4   :  { %519 = dma.done.wait [#allocation4], 128  }
 0x2e5   :  { %520 = vsyncadd [#allocation4], 4294967168 }
 0x2e6   :  { %521 = dma.done.wait [#allocation7], 16  }
 0x2e7   :  { %522 = vsyncadd [#allocation7], 4294967280 }
 0x2e8   :  { %339 = vsyncpa [#allocation3], 1 }
 0x2e9   :  { %340 = vsyncpa [#allocation4], 1 }
 0x2ea   :  { %341 = vsyncpa [#allocation7], 1 }

</bundles_post_ra>
